<compile_context>
chip_gen: v5e
topology: v5e:2x2
jax: 0.10.0
libtpu: 0.0.40
codegen_flags: <defaults>
</compile_context>

<pallas_src>
import functools

import jax
import jax.numpy as jnp
from jax.experimental import pallas as pl
from jax.experimental.pallas import tpu as pltpu


_MIB = 1 << 20
_VMEM_SAFE_CAP = 56 * _MIB       # below v7x's 64 MiB physical VMEM
_FUSED_SLAB_BUDGET = 6 * _MIB    # per-step (x + y) bytes for the fused path
_TILE_TARGET_BYTES = 2 * _MIB    # per-step x-tile bytes for the tiled path


def _scoped_vmem_limit(io_block_bytes, resident_bytes, temp_bytes):
    """Scoped-VMEM limit from actual buffer sizes (double-buffered io) + headroom."""
    est = 2 * io_block_bytes + 2 * resident_bytes + temp_bytes + 4 * _MIB
    return int(min(max(est, 24 * _MIB), _VMEM_SAFE_CAP))


def _pick_spatial_tile(S, C, in_bytes, target_bytes):
    """Spatial tile sized by bytes: multiple of 512 (>=128), or full S."""
    ts = target_bytes // max(1, C * in_bytes)
    if ts >= 512:
        ts = (ts // 512) * 512
    else:
        ts = max(128, (ts // 128) * 128)
    if ts >= S:
        return S          # full extent: always a legal block shape
    return ts


# ----------------------------------------------------------------------------
# Fused single-pass kernel: slab resident in VMEM -> mean + conv in one go.
# ----------------------------------------------------------------------------
def _gap_fused_kernel(x_ref, w_ref, b_ref, o_ref, *, inv_s):
    # x_ref: (Nb, C, S) activation dtype   w_ref: (C, C) activation dtype
    # b_ref: (C, 1) f32                    o_ref: (Nb, C, S)
    w = w_ref[...]
    bias = b_ref[...]
    for b in range(x_ref.shape[0]):        # small static unroll (Nb <= 8)
        x = x_ref[b]                                            # (C, S)
        xf = x.astype(jnp.float32)
        gc = jnp.sum(xf, axis=1, keepdims=True) * inv_s         # (C, 1) f32
        xa = (xf + gc).astype(x.dtype)                          # x + global ctx
        y = jnp.dot(w, xa, preferred_element_type=jnp.float32)  # (C, S) f32
        o_ref[b] = (y + bias).astype(o_ref.dtype)


# ----------------------------------------------------------------------------
# Tiled pass 1: global average pool over flattened spatial axis (f32 accum),
# with an explicit mask on the padded tail of the last (partial) tile.
# ----------------------------------------------------------------------------
def _gc_mean_kernel(x_ref, gc_ref, *, inv_s, spatial_size, tile, mask_tail):
    # x_ref : (1, C, ts) tile    gc_ref: (1, C, 1) f32, resident across S-tiles
    s = pl.program_id(1)

    @pl.when(s == 0)
    def _():
        gc_ref[...] = jnp.zeros_like(gc_ref)

    x = x_ref[...].astype(jnp.float32)
    if mask_tail:   # trace-time constant: only emitted when S % ts != 0
        lane = jax.lax.broadcasted_iota(jnp.int32, x.shape, 2) + s * tile
        x = jnp.where(lane < spatial_size, x, 0.0)
    gc_ref[...] += jnp.sum(x, axis=2, keepdims=True)

    @pl.when(s == pl.num_programs(1) - 1)
    def _():
        gc_ref[...] = gc_ref[...] * inv_s          # sum -> mean


# ----------------------------------------------------------------------------
# Tiled pass 2: y = W @ (x_tile + gc) + b, lane-dense output tile.
# ----------------------------------------------------------------------------
def _gap_conv_kernel(x_ref, w_ref, gc_ref, b_ref, o_ref):
    # x_ref: (1, C, ts)   w_ref: (C, C)   gc_ref: (1, C, 1) f32   b_ref: (C, 1) f32
    x = x_ref[0]                                                  # (C, ts)
    xa = (x.astype(jnp.float32) + gc_ref[0]).astype(x.dtype)
    y = jnp.dot(w_ref[...], xa, preferred_element_type=jnp.float32)
    o_ref[0] = (y + b_ref[...]).astype(o_ref.dtype)


def gap_forward(x_ncdhw, weight, bias, *,
                fused_slab_budget=_FUSED_SLAB_BUDGET,
                tile_target_bytes=_TILE_TARGET_BYTES):
    """x_ncdhw: (N, C, D, H, W); weight: (C_out, C_in) 1x1x1 conv; bias: (C_out,)."""
    N, C, D, H, W = x_ncdhw.shape
    C_out, C_in = weight.shape
    assert C_out == C and C_in == C, "GAP assumes a square 1x1x1 conv"

    S = D * H * W
    x_ncs = x_ncdhw.reshape(N, C, S)             # pure reshape, no data movement
    out_dtype = x_ncdhw.dtype
    in_b = jnp.dtype(x_ncdhw.dtype).itemsize
    out_b = jnp.dtype(out_dtype).itemsize

    w_mm = weight.astype(x_ncdhw.dtype)          # MXU operand dtype (f32 accum)
    w_bytes = C * C * jnp.dtype(w_mm.dtype).itemsize
    bias_col = bias.astype(jnp.float32).reshape(C, 1)
    inv_s = 1.0 / S

    # ------------------------------------------------------------------------
    # Fused single-pass path: one HBM read of x, one write of y.
    # ------------------------------------------------------------------------
    per_batch_io = C * S * (in_b + out_b)
    if 0 < per_batch_io <= fused_slab_budget:
        nb = int(min(N, 8, max(1, fused_slab_budget // per_batch_io)))
        nblk = pl.cdiv(N, nb)
        vmem = _scoped_vmem_limit(nb * per_batch_io, w_bytes + C * 4,
                                  12 * C * S)    # f32 temps per batch iter
        out_ncs = pl.pallas_call(
            functools.partial(_gap_fused_kernel, inv_s=inv_s),
            out_shape=jax.ShapeDtypeStruct((N, C, S), out_dtype),
            grid_spec=pltpu.PrefetchScalarGridSpec(
                num_scalar_prefetch=0,
                grid=(nblk,),
                in_specs=[
                    pl.BlockSpec((nb, C, S), lambda i: (i, 0, 0)),
                    pl.BlockSpec((C, C), lambda i: (0, 0)),
                    pl.BlockSpec((C, 1), lambda i: (0, 0)),
                ],
                out_specs=pl.BlockSpec((nb, C, S), lambda i: (i, 0, 0)),
            ),
            compiler_params=pltpu.CompilerParams(
                dimension_semantics=("parallel",),
                vmem_limit_bytes=vmem),
        )(x_ncs, w_mm, bias_col)
        return out_ncs.reshape(N, C, D, H, W)

    # ------------------------------------------------------------------------
    # Tiled two-pass fallback (big slabs). Byte-sized tiles, cdiv grid, masked
    # tail in the reduction pass.
    # ------------------------------------------------------------------------
    ts = _pick_spatial_tile(S, C, in_b, tile_target_bytes)
    ns = pl.cdiv(S, ts)
    mask_tail = (S % ts) != 0

    x_tile_b = C * ts * in_b
    y_tile_b = C * ts * out_b

    # ---- Pass 1: per-(n, c) spatial mean ------------------------------------
    vmem1 = _scoped_vmem_limit(x_tile_b + C * 4, 0, C * ts * 4)
    gc = pl.pallas_call(
        functools.partial(_gc_mean_kernel, inv_s=inv_s, spatial_size=S,
                          tile=ts, mask_tail=mask_tail),
        out_shape=jax.ShapeDtypeStruct((N, C, 1), jnp.float32),
        grid_spec=pltpu.PrefetchScalarGridSpec(
            num_scalar_prefetch=0,
            grid=(N, ns),
            in_specs=[pl.BlockSpec((1, C, ts), lambda n, s: (n, 0, s))],
            out_specs=pl.BlockSpec((1, C, 1), lambda n, s: (n, 0, 0)),
        ),
        compiler_params=pltpu.CompilerParams(
            dimension_semantics=("parallel", "arbitrary"),
            vmem_limit_bytes=vmem1),
    )(x_ncs)

    # ---- Pass 2: tiled 1x1x1 conv on (x + gc), lane-dense output ------------
    vmem2 = _scoped_vmem_limit(x_tile_b + y_tile_b + C * 4,
                               w_bytes + C * 4, 8 * C * ts)
    out_ncs = pl.pallas_call(
        _gap_conv_kernel,
        out_shape=jax.ShapeDtypeStruct((N, C, S), out_dtype),
        grid_spec=pltpu.PrefetchScalarGridSpec(
            num_scalar_prefetch=0,
            grid=(N, ns),
            in_specs=[
                pl.BlockSpec((1, C, ts), lambda n, s: (n, 0, s)),
                pl.BlockSpec((C, C), lambda n, s: (0, 0)),
                pl.BlockSpec((1, C, 1), lambda n, s: (n, 0, 0)),
                pl.BlockSpec((C, 1), lambda n, s: (0, 0)),
            ],
            out_specs=pl.BlockSpec((1, C, ts), lambda n, s: (n, 0, s)),
        ),
        compiler_params=pltpu.CompilerParams(
            dimension_semantics=("parallel", "parallel"),
            vmem_limit_bytes=vmem2),
    )(x_ncs, w_mm, gc, bias_col)

    return out_ncs.reshape(N, C, D, H, W)


def _reference(x_ncdhw, weight, bias):
    # Pure-JAX reference of the PyTorch forward: conv1x1x1(x + avgpool(x)).
    gc = jnp.mean(x_ncdhw, axis=(2, 3, 4), keepdims=True)      # (N,C,1,1,1)
    xa = x_ncdhw + gc
    y = jnp.einsum('ncdhw,oc->nodhw', xa, weight)
    return y + bias[None, :, None, None, None]


if __name__ == "__main__":
    key = jax.random.PRNGKey(0)
    k_x, k_w, k_b, k_x2 = jax.random.split(key, 4)

    N, C, D, H, W = 2, 4, 4, 16, 16            # S = 1024
    x = jax.random.normal(k_x, (N, C, D, H, W), dtype=jnp.float32)

    # Deterministic parameter init (PyTorch-style uniform(-1/sqrt(fan_in), +)).
    fan_in = C                                  # kernel_size = 1x1x1
    bound = 1.0 / (fan_in ** 0.5)
    weight = jax.random.uniform(k_w, (C, C), minval=-bound, maxval=bound,
                                dtype=jnp.float32)             # (C_out, C_in)
    bias = jax.random.uniform(k_b, (C,), minval=-bound, maxval=bound,
                              dtype=jnp.float32)

    # Path 1: fused single-pass kernel (slab fits VMEM) — the common case.
    out = jax.block_until_ready(gap_forward(x, weight, bias))
    ref = _reference(x, weight, bias)
    assert out.shape == (N, C, D, H, W)
    assert jnp.allclose(out, ref, atol=1e-4, rtol=1e-4)

    # Path 2: tiled two-pass fallback with a non-dividing (masked) last tile:
    # S = 3*16*16 = 768, forced tile ts = 512 -> cdiv grid of 2, masked tail.
    x2 = jax.random.normal(k_x2, (N, C, 3, 16, 16), dtype=jnp.float32)
    out2 = jax.block_until_ready(
        gap_forward(x2, weight, bias, fused_slab_budget=0,
                    tile_target_bytes=8192))
    ref2 = _reference(x2, weight, bias)
    assert out2.shape == x2.shape
    assert jnp.allclose(out2, ref2, atol=1e-4, rtol=1e-4)

    print("KERNEL_OK")
</pallas_src>

<mosaic_0001>
module attributes {stable_mosaic.version = 11 : i64} {
  func.func @_gap_fused_kernel(%arg0: i32, %arg1: memref<2x4x1024xf32, #tpu.memory_space<vmem>>, %arg2: memref<4x4xf32, #tpu.memory_space<vmem>>, %arg3: memref<4x1xf32, #tpu.memory_space<vmem>>, %arg4: memref<2x4x1024xf32, #tpu.memory_space<vmem>>) attributes {dimension_semantics = [#tpu.dimension_semantics<parallel>], iteration_bounds = array<i64: 1>, scalar_prefetch = 0 : i64, scratch_operands = 0 : i64, tpu.core_type = #tpu.core_type<tc>, window_params = [{transform_indices = @transform_0, window_bounds = array<i64: 2, 4, 1024>}, {pipeline_mode = #tpu.pipeline_mode<synchronous>, transform_indices = @transform_1, window_bounds = array<i64: 4, 4>}, {pipeline_mode = #tpu.pipeline_mode<synchronous>, transform_indices = @transform_2, window_bounds = array<i64: 4, 1>}, {transform_indices = @transform_3, window_bounds = array<i64: 2, 4, 1024>}]} {
    %c0 = arith.constant 0 : index
    %c0_0 = arith.constant 0 : index
    %0 = vector.load %arg2[%c0, %c0_0] : memref<4x4xf32, #tpu.memory_space<vmem>>, vector<4x4xf32>
    %c0_1 = arith.constant 0 : index
    %c0_2 = arith.constant 0 : index
    %1 = vector.load %arg3[%c0_1, %c0_2] : memref<4x1xf32, #tpu.memory_space<vmem>>, vector<4x1xf32>
    %c0_3 = arith.constant 0 : index
    %c0_4 = arith.constant 0 : index
    %c0_5 = arith.constant 0 : index
    %2 = vector.load %arg1[%c0_3, %c0_4, %c0_5] : memref<2x4x1024xf32, #tpu.memory_space<vmem>>, vector<1x4x1024xf32>
    %3 = vector.shape_cast %2 : vector<1x4x1024xf32> to vector<4x1024xf32>
    %cst = arith.constant dense<0.000000e+00> : vector<4xf32>
    %4 = vector.multi_reduction <add>, %3, %cst [1] : vector<4x1024xf32> to vector<4xf32>
    %5 = vector.shape_cast %4 : vector<4xf32> to vector<4x1xf32>
    %cst_6 = arith.constant 9.765625E-4 : f32
    %6 = vector.broadcast %cst_6 : f32 to vector<4x1xf32>
    %7 = arith.mulf %5, %6 : vector<4x1xf32>
    %8 = vector.broadcast %7 : vector<4x1xf32> to vector<4x1024xf32>
    %9 = arith.addf %3, %8 : vector<4x1024xf32>
    %cst_7 = arith.constant dense<0.000000e+00> : vector<4x1024xf32>
    %10 = tpu.matmul %0, %9, %cst_7 {dimension_numbers = #tpu.dot_dimension_numbers<[1], [0], [0], [1], [0, 0, 1, 1], [], []>} : vector<4x4xf32>, vector<4x1024xf32>, vector<4x1024xf32> -> vector<4x1024xf32>
    %11 = vector.broadcast %1 : vector<4x1xf32> to vector<4x1024xf32>
    %12 = arith.addf %10, %11 : vector<4x1024xf32>
    %c0_8 = arith.constant 0 : index
    %c0_9 = arith.constant 0 : index
    %c0_10 = arith.constant 0 : index
    %13 = vector.load %arg4[%c0_8, %c0_9, %c0_10] : memref<2x4x1024xf32, #tpu.memory_space<vmem>>, vector<1x4x1024xf32>
    %14 = vector.shape_cast %13 : vector<1x4x1024xf32> to vector<4x1024xf32>
    %15 = vector.shape_cast %12 : vector<4x1024xf32> to vector<1x4x1024xf32>
    tpu.vector_store %arg4[%c0_8, %c0_9, %c0_10], %15 {strides = array<i32>} : memref<2x4x1024xf32, #tpu.memory_space<vmem>>, vector<1x4x1024xf32>,
    %c1 = arith.constant 1 : index
    %c0_11 = arith.constant 0 : index
    %c0_12 = arith.constant 0 : index
    %16 = vector.load %arg1[%c1, %c0_11, %c0_12] : memref<2x4x1024xf32, #tpu.memory_space<vmem>>, vector<1x4x1024xf32>
    %17 = vector.shape_cast %16 : vector<1x4x1024xf32> to vector<4x1024xf32>
    %cst_13 = arith.constant dense<0.000000e+00> : vector<4xf32>
    %18 = vector.multi_reduction <add>, %17, %cst_13 [1] : vector<4x1024xf32> to vector<4xf32>
    %19 = vector.shape_cast %18 : vector<4xf32> to vector<4x1xf32>
    %cst_14 = arith.constant 9.765625E-4 : f32
    %20 = vector.broadcast %cst_14 : f32 to vector<4x1xf32>
    %21 = arith.mulf %19, %20 : vector<4x1xf32>
    %22 = vector.broadcast %21 : vector<4x1xf32> to vector<4x1024xf32>
    %23 = arith.addf %17, %22 : vector<4x1024xf32>
    %cst_15 = arith.constant dense<0.000000e+00> : vector<4x1024xf32>
    %24 = tpu.matmul %0, %23, %cst_15 {dimension_numbers = #tpu.dot_dimension_numbers<[1], [0], [0], [1], [0, 0, 1, 1], [], []>} : vector<4x4xf32>, vector<4x1024xf32>, vector<4x1024xf32> -> vector<4x1024xf32>
    %25 = vector.broadcast %1 : vector<4x1xf32> to vector<4x1024xf32>
    %26 = arith.addf %24, %25 : vector<4x1024xf32>
    %c1_16 = arith.constant 1 : index
    %c0_17 = arith.constant 0 : index
    %c0_18 = arith.constant 0 : index
    %27 = vector.load %arg4[%c1_16, %c0_17, %c0_18] : memref<2x4x1024xf32, #tpu.memory_space<vmem>>, vector<1x4x1024xf32>
    %28 = vector.shape_cast %27 : vector<1x4x1024xf32> to vector<4x1024xf32>
    %29 = vector.shape_cast %26 : vector<4x1024xf32> to vector<1x4x1024xf32>
    tpu.vector_store %arg4[%c1_16, %c0_17, %c0_18], %29 {strides = array<i32>} : memref<2x4x1024xf32, #tpu.memory_space<vmem>>, vector<1x4x1024xf32>,
    return
  }
  func.func @transform_0(%arg0: i32) -> (i32, i32, i32) {
    %c0_i32 = arith.constant 0 : i32
    %c0_i32_0 = arith.constant 0 : i32
    %c0_i32_1 = arith.constant 0 : i32
    return %arg0, %c0_i32, %c0_i32_0 : i32, i32, i32
  }
  func.func @transform_1(%arg0: i32) -> (i32, i32) {
    %c0_i32 = arith.constant 0 : i32
    %c0_i32_0 = arith.constant 0 : i32
    %c0_i32_1 = arith.constant 0 : i32
    return %c0_i32, %c0_i32_0 : i32, i32
  }
  func.func @transform_2(%arg0: i32) -> (i32, i32) {
    %c0_i32 = arith.constant 0 : i32
    %c0_i32_0 = arith.constant 0 : i32
    %c0_i32_1 = arith.constant 0 : i32
    return %c0_i32, %c0_i32_0 : i32, i32
  }
  func.func @transform_3(%arg0: i32) -> (i32, i32, i32) {
    %c0_i32 = arith.constant 0 : i32
    %c0_i32_0 = arith.constant 0 : i32
    %c0_i32_1 = arith.constant 0 : i32
    return %arg0, %c0_i32, %c0_i32_0 : i32, i32, i32
  }
}

</mosaic_0001>

<bundles_post_ra>
// kernel: tpu_custom_call.1
= control target key start
LH: loop header
LB: loop body
LE: loop exit
PB: predicated region body
PF: predicated region fallthrough
CT: control target
= control target key end

     0   :  { %8 = vsyncpa [#allocation3], 0  ;;  %s827_s0 = inlined_call_operand.hbm [shape: f32[2,4,1024], index: 0, kind: input, shape index: {}]   ;;  %s828_s1 = inlined_call_operand.vmem [shape: f32[4,4], index: 1, kind: input, shape index: {}]   ;;  %s829_s2 = inlined_call_operand.vmem [shape: f32[4,1], index: 2, kind: input, shape index: {}]   ;;  %s830_s3 = inlined_call_operand.hbm [shape: f32[2,4,1024], index: 3, kind: output, shape index: {}]  }
   0x1   :  { %9 = vsyncpa [#allocation4], 0  ;;  %s14_s14 = sshll.u32 %s827_s0, 4  ;;  %s712_s15 = smov [#allocation2]   ;;  %s15_s14 = int_to_ptr.hbm [resolvable:$true] %s14_s14 }
   0x2   :  { %s16_s16 = sshll.u32 %s712_s15, 4  ;;  %s713_s17 = smov 512   ;;  %s17_s16 = int_to_ptr.vmem [resolvable:$true] %s16_s16 }
   0x3   :  { %s714_s18 = smov 32  }
   0x4   :  { %22 = dma.hbm_to_vmem [thread:$0]  %s15_s14, 1024, %s17_s16, [#allocation3], %s713_s17, %s713_s17, %s714_s18  }
   0x5   :  { %708 = dma.done.wait [#allocation3], 1024  }
   0x6   :  { %709 = vsyncadd [#allocation3], 4294966272  ;;  %v33_v0 = vld [vmem:[#allocation2] sm:$0xff]  ;;  %v34_v1 = vld [vmem:[#allocation2 + $0x8] sm:$0xff]  ;;  %vm64_vm0 = vcmask 1043456   ;;  %vm117_vm1 = vcmask 31744  }
   0x7   :  { %v35_v2 = vld [vmem:[#allocation2 + $0x10] sm:$0xff]  ;;  %v36_v3 = vld [vmem:[#allocation2 + $0x18] sm:$0xff]  ;;  %41 = vst [vmem:[#allocation1] ss:$2 sm:$0xff] %v33_v0  ;;  %v715_v27 = vmov 839922192  }
   0x8   :  { %43 = vst [vmem:[#allocation1 + $0x10] ss:$2 sm:$0xff] %v34_v1  ;;  %v752_v28 = vunpack.c.l.s4 %v715_v27  ;;  %v757_v37 = vld [vmem:[#allocation2 + $0x20] sm:$0xff]  ;;  %v759_v38 = vld [vmem:[#allocation2 + $0x28] sm:$0xff]  ;;  %v324_v42 = vld [vmem:[#allocation2 + $0x30] sm:$0xff]  ;;  %s607_s24 = sshll.u32 %s830_s3, 4  ;;  %s608_s24 = int_to_ptr.hbm [resolvable:$true] %s607_s24 }
   0x9   :  { %45 = vst [vmem:[#allocation1 + $0x20] ss:$2 sm:$0xff] %v35_v2  ;;  %v325_v46 = vld [vmem:[#allocation2 + $0x38] sm:$0xff] }
   0xa   :  { %47 = vst [vmem:[#allocation1 + $0x30] ss:$2 sm:$0xff] %v36_v3  ;;  %v86_v29 = vunpack.c.0.s8 %v752_v28 }
   0xe   :  { %v48_v4 = vld.sshfl [vmem:[#allocation1] sm:$0xff pattern:$0x75316420]  ;;  %v49_v5 = vld.sshfl [vmem:[#allocation1 + $0x8] sm:$0xff pattern:$0x75316420] }
   0xf   :  { %v50_v6 = vld.sshfl [vmem:[#allocation1 + $0x10] sm:$0xff pattern:$0x75316420]  ;;  %v51_v7 = vld.sshfl [vmem:[#allocation1 + $0x18] sm:$0xff pattern:$0x75316420] }
  0x10   :  { %v65_v8 = vsel %vm64_vm0, %v48_v4, 0.0  ;;  %v66_v9 = vsel %vm64_vm0, %v49_v5, 0.0  ;;  %v68_v10 = vsel %vm64_vm0, %v50_v6, 0.0  ;;  %v52_v11 = vld.sshfl [vmem:[#allocation1 + $0x20] sm:$0xff pattern:$0x75316420] }
  0x11   :  { %v67_v12 = vadd.f32 %v66_v9, %v65_v8  ;;  %v70_v13 = vsel %vm64_vm0, %v51_v7, 0.0  ;;  %v53_v14 = vld.sshfl [vmem:[#allocation1 + $0x28] sm:$0xff pattern:$0x75316420]  ;;  %v72_v16 = vsel %vm64_vm0, %v52_v11, 0.0 }
  0x12   :  { %v54_v17 = vld.sshfl [vmem:[#allocation1 + $0x30] sm:$0xff pattern:$0x75316420]  ;;  %v74_v19 = vsel %vm64_vm0, %v53_v14, 0.0  ;;  %v31_v8 = vld [vmem:[%s828_s1] sm:$0xf] }
  0x13   :  { %v69_v15 = vadd.f32 %v68_v10, %v67_v12  ;;  %v55_v20 = vld.sshfl [vmem:[#allocation1 + $0x38] sm:$0xff pattern:$0x75316420]  ;;  %v76_v22 = vsel %vm64_vm0, %v54_v17, 0.0  ;;  %v32_v9 = vld [vmem:[%s829_s2] sm:$0xf] }
  0x14   :  { %v78_v24 = vsel %vm64_vm0, %v55_v20, 0.0  ;;  %v716_v10 = vmov 0   ;;  %s717_s1 = smov [#allocation5]  }
  0x15   :  { %v71_v18 = vadd.f32 %v70_v13, %v69_v15  ;;  %658 = vset.pattern.permute.xlu1 %v716_v10  ;;  %659 = vset.pattern.permute.xlu0 %v716_v10  ;;  %s605_s2 = sshll.u32 %s717_s1, 4  ;;  %s606_s2 = int_to_ptr.vmem [resolvable:$true] %s605_s2 }
  0x16   :  { %95 = vperm.xlu1 %658, %v32_v9  }
  0x17   :  { %v73_v21 = vadd.f32 %v72_v16, %v71_v18 }
  0x19   :  { %v75_v23 = vadd.f32 %v74_v19, %v73_v21 }
  0x1b   :  { %v77_v25 = vadd.f32 %v76_v22, %v75_v23 }
  0x1d   :  { %v79_v26 = vadd.f32 %v78_v24, %v77_v25 }
  0x1f   :  { %80 = vadd.xlane.f32.xlu0 %v79_v26 }
  0x92   :  { %v81_v30 = vpop.xlane.xlu0 %80 }
  0x93   :  { %v82_v31 = vmul.f32 0.0009765625, %v81_v30 }
  0x95   :  { %v87_v32 = vperm.slane %v82_v31, %v86_v29 }
  0x97   :  { %v89_v33 = vadd.f32 %v87_v32, %v33_v0  ;;  %v90_v34 = vadd.f32 %v87_v32, %v34_v1  ;;  %v91_v35 = vadd.f32 %v87_v32, %v35_v2  ;;  %v92_v36 = vadd.f32 %v87_v32, %v36_v3 }
  0x99   :  { %102 = vst [vmem:[#allocation1] ss:$2 sm:$0xff] %v89_v33 }
  0x9a   :  { %104 = vst [vmem:[#allocation1 + $0x10] ss:$2 sm:$0xff] %v90_v34 }
  0x9b   :  { %106 = vst [vmem:[#allocation1 + $0x20] ss:$2 sm:$0xff] %v91_v35 }
  0x9c   :  { %108 = vst [vmem:[#allocation1 + $0x30] ss:$2 sm:$0xff] %v92_v36 }
  0xa0   :  { %v109_v39 = vld.sshfl [vmem:[#allocation1] sm:$0xff pattern:$0x75316420]  ;;  %v110_v40 = vld.sshfl [vmem:[#allocation1 + $0x8] sm:$0xff pattern:$0x75316420] }
  0xa1   :  { %620 = vmatpush.msk.msra.mxu0 %vm64_vm0, %v109_v39  ;;  %622 = vmatpush.msk.msra.mxu1 %vm64_vm0, %v110_v40  ;;  %330 = vst [vmem:[#allocation1] ss:$2 sm:$0xff] %v757_v37  ;;  %v111_v41 = vld.sshfl [vmem:[#allocation1 + $0x10] sm:$0xff pattern:$0x75316420] }
  0xa2   :  { %624 = vmatpush.msk.msra.mxu2 %vm64_vm0, %v111_v41  ;;  %v112_v43 = vld.sshfl [vmem:[#allocation1 + $0x18] sm:$0xff pattern:$0x75316420]  ;;  %v113_v44 = vld.sshfl [vmem:[#allocation1 + $0x20] sm:$0xff pattern:$0x75316420]  ;;  %621 = vmatmul.msk.f32.vlgmr.msra.gmra.mxu0 %vm117_vm1, %v31_v8 }
  0xa3   :  { %626 = vmatpush.msk.msra.mxu3 %vm64_vm0, %v112_v43  ;;  %332 = vst [vmem:[#allocation1 + $0x10] ss:$2 sm:$0xff] %v759_v38  ;;  %628 = vmatpush.msk.msrb.mxu0 %vm64_vm0, %v113_v44  ;;  %v114_v45 = vld.sshfl [vmem:[#allocation1 + $0x28] sm:$0xff pattern:$0x75316420] }
  0xa4   :  { %630 = vmatpush.msk.msrb.mxu1 %vm64_vm0, %v114_v45  ;;  %334 = vst [vmem:[#allocation1 + $0x20] ss:$2 sm:$0xff] %v324_v42  ;;  %v115_v47 = vld.sshfl [vmem:[#allocation1 + $0x30] sm:$0xff pattern:$0x75316420]  ;;  %627 = vmatmul.msk.f32.vlgmr.msra.gmra.mxu3 %vm117_vm1, %v31_v8 }
  0xa5   :  { %632 = vmatpush.msk.msrb.mxu2 %vm64_vm0, %v115_v47  ;;  %v116_v48 = vld.sshfl [vmem:[#allocation1 + $0x38] sm:$0xff pattern:$0x75316420]  ;;  %623 = vmatmul.msk.f32.vlgmr.msra.gmra.mxu1 %vm117_vm1, %v31_v8 }
  0xa6   :  { %634 = vmatpush.msk.msrb.mxu3 %vm64_vm0, %v116_v48  ;;  %336 = vst [vmem:[#allocation1 + $0x30] ss:$2 sm:$0xff] %v325_v46  ;;  %625 = vmatmul.msk.f32.vlgmr.msra.gmra.mxu2 %vm117_vm1, %v31_v8 }
  0xa8   :  { %v337_v49 = vld.sshfl [vmem:[#allocation1] sm:$0xff pattern:$0x75316420]  ;;  %v338_v50 = vld.sshfl [vmem:[#allocation1 + $0x8] sm:$0xff pattern:$0x75316420] }
  0xa9   :  { %v353_v51 = vsel %vm64_vm0, %v337_v49, 0.0  ;;  %v354_v52 = vsel %vm64_vm0, %v338_v50, 0.0 }
  0xaa   :  { %v339_v53 = vld.sshfl [vmem:[#allocation1 + $0x10] sm:$0xff pattern:$0x75316420]  ;;  %v340_v54 = vld.sshfl [vmem:[#allocation1 + $0x18] sm:$0xff pattern:$0x75316420]  ;;  %v355_v55 = vadd.f32 %v354_v52, %v353_v51  ;;  %629 = vmatmul.msk.f32.vlgmr.msrb.gmra.mxu0 %vm117_vm1, %v31_v8 }
  0xab   :  { %v341_v56 = vld.sshfl [vmem:[#allocation1 + $0x20] sm:$0xff pattern:$0x75316420]  ;;  %v356_v57 = vsel %vm64_vm0, %v339_v53, 0.0  ;;  %v358_v58 = vsel %vm64_vm0, %v340_v54, 0.0 }
  0xac   :  { %v342_v59 = vld.sshfl [vmem:[#allocation1 + $0x28] sm:$0xff pattern:$0x75316420]  ;;  %v357_v60 = vadd.f32 %v356_v57, %v355_v55  ;;  %v360_v61 = vsel %vm64_vm0, %v341_v56, 0.0  ;;  %635 = vmatmul.msk.f32.vlgmr.msrb.gmra.mxu3 %vm117_vm1, %v31_v8 }
  0xad   :  { %v343_v62 = vld.sshfl [vmem:[#allocation1 + $0x30] sm:$0xff pattern:$0x75316420]  ;;  %v362_v0 = vsel %vm64_vm0, %v342_v59, 0.0  ;;  %631 = vmatmul.msk.f32.vlgmr.msrb.gmra.mxu1 %vm117_vm1, %v31_v8 }
  0xae   :  { %v359_v63 = vadd.f32 %v358_v58, %v357_v60  ;;  %v344_v1 = vld.sshfl [vmem:[#allocation1 + $0x38] sm:$0xff pattern:$0x75316420]  ;;  %v364_v3 = vsel %vm64_vm0, %v343_v62, 0.0  ;;  %633 = vmatmul.msk.f32.vlgmr.msrb.gmra.mxu2 %vm117_vm1, %v31_v8 }
  0xaf   :  { %v366_v5 = vsel %vm64_vm0, %v344_v1, 0.0 }
  0xb0   :  { %v361_v2 = vadd.f32 %v360_v61, %v359_v63 }
  0xb2   :  { %v363_v4 = vadd.f32 %v362_v0, %v361_v2 }
  0xb4   :  { %v365_v6 = vadd.f32 %v364_v3, %v363_v4 }
  0xb6   :  { %v367_v7 = vadd.f32 %v366_v5, %v365_v6 }
  0xb8   :  { %368 = vadd.xlane.f32.xlu0 %v367_v7 }
 0x11f   :  { %v154_v27 = vpop.f32.mrf.mxu0 }
 0x122   :  { %v174_v26 = vpop.f32.mrf.mxu1 }
 0x127   :  { %v214_v28 = vpop.f32.mrf.mxu3 }
 0x129   :  { %v194_v32 = vpop.f32.mrf.mxu2 }
 0x12b   :  { %v369_v11 = vpop.xlane.xlu0 %368 }
 0x12c   :  { %v370_v12 = vmul.f32 0.0009765625, %v369_v11 }
 0x12e   :  { %v375_v13 = vperm.slane %v370_v12, %v86_v29  ;;  %v96_v29 = vpop.permute.xlu1 %95 }
 0x12f   :  { %v155_v30 = vadd.f32 %v154_v27, %v96_v29  ;;  %v175_v31 = vadd.f32 %v174_v26, %v96_v29  ;;  %v215_v33 = vadd.f32 %v214_v28, %v96_v29  ;;  %v195_v34 = vadd.f32 %v194_v32, %v96_v29  ;;  %v294_v44 = vpop.f32.mrf.mxu3 }
 0x130   :  { %v377_v14 = vadd.f32 %v375_v13, %v757_v37  ;;  %v378_v15 = vadd.f32 %v375_v13, %v759_v38  ;;  %v379_v16 = vadd.f32 %v375_v13, %v324_v42  ;;  %v380_v17 = vadd.f32 %v375_v13, %v325_v46  ;;  %v254_v37 = vpop.f32.mrf.mxu1  ;;  %v234_v38 = vpop.f32.mrf.mxu0 }
 0x131   :  { %v305_v35 = vrot.slane %v175_v31, 4  ;;  %v306_v36 = vrot.slane %v215_v33, 4  ;;  %v255_v39 = vadd.f32 %v254_v37, %v96_v29  ;;  %v235_v40 = vadd.f32 %v234_v38, %v96_v29  ;;  %v274_v47 = vpop.f32.mrf.mxu2 }
 0x132   :  { %385 = vst [vmem:[#allocation1] ss:$2 sm:$0xff] %v377_v14  ;;  %v295_v46 = vadd.f32 %v294_v44, %v96_v29  ;;  %v275_v48 = vadd.f32 %v274_v47, %v96_v29 }
 0x133   :  { %387 = vst [vmem:[#allocation1 + $0x10] ss:$2 sm:$0xff] %v378_v15  ;;  %v309_v41 = vsel %vm64_vm0, %v155_v30, %v305_v35  ;;  %v310_v42 = vsel %vm64_vm0, %v195_v34, %v306_v36  ;;  %v307_v43 = vrot.slane %v255_v39, 4 }
 0x134   :  { %389 = vst [vmem:[#allocation1 + $0x20] ss:$2 sm:$0xff] %v379_v16  ;;  %v308_v49 = vrot.slane %v295_v46, 4 }
 0x135   :  { %391 = vst [vmem:[#allocation1 + $0x30] ss:$2 sm:$0xff] %v380_v17  ;;  %v311_v45 = vsel %vm64_vm0, %v235_v40, %v307_v43 }
 0x136   :  { %317 = vst [vmem:[#allocation5] sm:$0xff] %v309_v41  ;;  %v312_v50 = vsel %vm64_vm0, %v275_v48, %v308_v49 }
 0x137   :  { %318 = vst [vmem:[#allocation5 + $0x8] sm:$0xff] %v310_v42 }
 0x138   :  { %319 = vst [vmem:[#allocation5 + $0x10] sm:$0xff] %v311_v45 }
 0x139   :  { %v392_v18 = vld.sshfl [vmem:[#allocation1] sm:$0xff pattern:$0x75316420]  ;;  %v393_v19 = vld.sshfl [vmem:[#allocation1 + $0x8] sm:$0xff pattern:$0x75316420] }
 0x13a   :  { %636 = vmatpush.msk.msra.mxu0 %vm64_vm0, %v392_v18  ;;  %638 = vmatpush.msk.msra.mxu1 %vm64_vm0, %v393_v19  ;;  %v394_v20 = vld.sshfl [vmem:[#allocation1 + $0x10] sm:$0xff pattern:$0x75316420]  ;;  %v395_v21 = vld.sshfl [vmem:[#allocation1 + $0x18] sm:$0xff pattern:$0x75316420] }
 0x13b   :  { %640 = vmatpush.msk.msra.mxu2 %vm64_vm0, %v394_v20  ;;  %642 = vmatpush.msk.msra.mxu3 %vm64_vm0, %v395_v21  ;;  %v396_v22 = vld.sshfl [vmem:[#allocation1 + $0x20] sm:$0xff pattern:$0x75316420]  ;;  %v397_v23 = vld.sshfl [vmem:[#allocation1 + $0x28] sm:$0xff pattern:$0x75316420] }
 0x13c   :  { %644 = vmatpush.msk.msrb.mxu0 %vm64_vm0, %v396_v22  ;;  %646 = vmatpush.msk.msrb.mxu1 %vm64_vm0, %v397_v23  ;;  %v398_v24 = vld.sshfl [vmem:[#allocation1 + $0x30] sm:$0xff pattern:$0x75316420]  ;;  %v399_v25 = vld.sshfl [vmem:[#allocation1 + $0x38] sm:$0xff pattern:$0x75316420] }
 0x13d   :  { %648 = vmatpush.msk.msrb.mxu2 %vm64_vm0, %v398_v24  ;;  %650 = vmatpush.msk.msrb.mxu3 %vm64_vm0, %v399_v25  ;;  %320 = vst [vmem:[#allocation5 + $0x18] sm:$0xff] %v312_v50 }
 0x13e   :  { %643 = vmatmul.msk.f32.vlgmr.msra.gmra.mxu3 %vm117_vm1, %v31_v8  ;;  %641 = vmatmul.msk.f32.vlgmr.msra.gmra.mxu2 %vm117_vm1, %v31_v8 }
 0x13f   :  { %639 = vmatmul.msk.f32.vlgmr.msra.gmra.mxu1 %vm117_vm1, %v31_v8  ;;  %637 = vmatmul.msk.f32.vlgmr.msra.gmra.mxu0 %vm117_vm1, %v31_v8 }
 0x146   :  { %651 = vmatmul.msk.f32.vlgmr.msrb.gmra.mxu3 %vm117_vm1, %v31_v8  ;;  %649 = vmatmul.msk.f32.vlgmr.msrb.gmra.mxu2 %vm117_vm1, %v31_v8 }
 0x147   :  { %647 = vmatmul.msk.f32.vlgmr.msrb.gmra.mxu1 %vm117_vm1, %v31_v8  ;;  %645 = vmatmul.msk.f32.vlgmr.msrb.gmra.mxu0 %vm117_vm1, %v31_v8 }
 0x1bc   :  { %v453_v51 = vpop.f32.mrf.mxu1  ;;  %v433_v52 = vpop.f32.mrf.mxu0 }
 0x1bd   :  { %v454_v53 = vadd.f32 %v453_v51, %v96_v29  ;;  %v434_v54 = vadd.f32 %v433_v52, %v96_v29 }
 0x1bf   :  { %v584_v55 = vrot.slane %v454_v53, 4 }
 0x1c1   :  { %v493_v56 = vpop.f32.mrf.mxu3  ;;  %v588_v57 = vsel %vm64_vm0, %v434_v54, %v584_v55  ;;  %v473_v58 = vpop.f32.mrf.mxu2 }
 0x1c2   :  { %v494_v59 = vadd.f32 %v493_v56, %v96_v29  ;;  %597 = vst [vmem:[#allocation5 + $0x20] sm:$0xff] %v588_v57  ;;  %v474_v60 = vadd.f32 %v473_v58, %v96_v29 }
 0x1c4   :  { %v585_v61 = vrot.slane %v494_v59, 4  ;;  %v533_v62 = vpop.f32.mrf.mxu1  ;;  %v513_v63 = vpop.f32.mrf.mxu0 }
 0x1c5   :  { %v534_v0 = vadd.f32 %v533_v62, %v96_v29  ;;  %v514_v1 = vadd.f32 %v513_v63, %v96_v29 }
 0x1c6   :  { %v589_v2 = vsel %vm64_vm0, %v474_v60, %v585_v61 }
 0x1c7   :  { %598 = vst [vmem:[#allocation5 + $0x28] sm:$0xff] %v589_v2  ;;  %v586_v3 = vrot.slane %v534_v0, 4 }
 0x1c9   :  { %v573_v4 = vpop.f32.mrf.mxu3  ;;  %v590_v5 = vsel %vm64_vm0, %v514_v1, %v586_v3  ;;  %v553_v6 = vpop.f32.mrf.mxu2 }
 0x1ca   :  { %v574_v7 = vadd.f32 %v573_v4, %v96_v29  ;;  %599 = vst [vmem:[#allocation5 + $0x30] sm:$0xff] %v590_v5  ;;  %v554_v9 = vadd.f32 %v553_v6, %v96_v29 }
 0x1cc   :  { %v587_v8 = vrot.slane %v574_v7, 4 }
 0x1ce   :  { %v591_v10 = vsel %vm64_vm0, %v554_v9, %v587_v8 }
 0x1cf   :  { %600 = vst [vmem:[#allocation5 + $0x38] sm:$0xff] %v591_v10 }
 0x1d0   :  { %613 = dma.vmem_to_hbm [thread:$0]  %s606_s2, 1024, %s608_s24, [#allocation4], %s713_s17, %s713_s17, %s714_s18  }
 0x1d1   :  { %710 = dma.done.wait [#allocation4], 1024  }
 0x1d2   :  { %711 = vsyncadd [#allocation4], 4294966272 }
 0x1d3   :  { %618 = vsyncpa [#allocation3], 1 }
 0x1d4   :  { %619 = vsyncpa [#allocation4], 1 }

</bundles_post_ra>
